<compile_context>
chip_gen: v7x
topology: tpu7x:2x2x1
jax: 0.10.0
libtpu: 0.0.40
codegen_flags: <defaults>
</compile_context>

<pallas_src>
import jax
import jax.numpy as jnp
from jax.experimental import pallas as pl
from jax.experimental.pallas import tpu as pltpu


# Packed-row tile bounds.  256 rows ~= 128 KiB per stream per step (keeps the
# ~0.35 us/step overhead small even at v7x's 3.2 TB/s HBM); 2048 rows = 1 MiB
# per stream -> 3 streams x 2 buffers = 6 MiB double-buffered VMEM.
_MIN_TM = 256
_MAX_TM = 2048


def _interest_kernel(st_ref, sg_ref, wseg_ref, b_ref, out_ref):
    st = st_ref[...].astype(jnp.float32)   # (tm, 128): 128//D samples per row
    sg = sg_ref[...].astype(jnp.float32)   # (tm, 128)
    b = b_ref[0]                           # scalar bias from SMEM

    # Segmented Linear(D -> 1) + within-segment broadcast as one MXU matmul:
    # wseg[j, d] = w[j % D] if j // D == d // D else 0, so lane d of the
    # result is the logit of the sample occupying d's D-lane segment, already
    # broadcast across that segment.  MXU has no other work in this kernel.
    logit = jnp.dot(st, wseg_ref[...], preferred_element_type=jnp.float32) + b
    gamma = jax.nn.sigmoid(logit)          # (tm, 128)

    # gamma*st + (1-gamma)*sg == sg + gamma*(st - sg)  (one fewer multiply)
    out_ref[...] = (sg + gamma * (st - sg)).astype(out_ref.dtype)


def _pick_tm(rows, tm):
    """Pick the packed-row tile size (rows is already a multiple of 8)."""
    if tm is not None:
        tm = min(int(tm), rows)
        if tm != rows and tm % 8 != 0:
            raise ValueError("explicit tm must be a multiple of 8 or >= rows")
        return tm
    t = -(-rows // 8)                       # aim for ~8 grid steps
    t = max(_MIN_TM, min(_MAX_TM, t))       # 128 KiB .. 1 MiB per stream/step
    t = ((t + 7) // 8) * 8                  # sublane multiple
    return rows if t >= rows else t


def interest_forward(s_t, s_g, weight, bias, *, tm=None):
    """Fused Pallas kernel for the Interest gate.

    s_t, s_g: (B, D) with D dividing 128 (D = head_num * head_dim, e.g. 32);
    weight: (1, D) or (D,); bias: scalar / (1,) / (1, 1).  Returns (B, D).
    """
    B, D = s_t.shape
    assert s_g.shape == (B, D)
    assert D <= 128 and 128 % D == 0, "packed layout needs D to divide 128"
    # TODO(synk): add a generic-D (non-divisor-of-128) path if ever needed.
    pack = 128 // D

    # Pad B so the packed row count is a multiple of 8 (sublane tile); padded
    # rows are computed on garbage and sliced off at the end.
    row_mult = pack * 8
    Bpad = -(-B // row_mult) * row_mult
    if Bpad != B:
        padding = ((0, Bpad - B), (0, 0))
        s_t = jnp.pad(s_t, padding)
        s_g = jnp.pad(s_g, padding)
    Bp = Bpad // pack

    # Free row-major repack: `pack` consecutive samples share one 128-lane row.
    st_p = s_t.reshape(Bp, 128)
    sg_p = s_g.reshape(Bp, 128)

    # Block-diagonal segment matrix with the Linear weights folded in:
    # wseg[j, d] = w[j % D] * (j // D == d // D).  64 KiB, DMA'd once.
    lane = jnp.arange(128)
    seg = (lane[:, None] // D == lane[None, :] // D).astype(jnp.float32)
    w128 = jnp.tile(jnp.asarray(weight, jnp.float32).reshape(1, D), (1, pack))
    wseg = seg * w128.reshape(128, 1)

    # Flat (1,) bias on the cheap SMEM scalar path.
    bias_1d = jnp.asarray(bias, dtype=jnp.float32).reshape((1,))

    tm = _pick_tm(Bp, tm)
    grid = (pl.cdiv(Bp, tm),)

    out_p = pl.pallas_call(
        _interest_kernel,
        out_shape=jax.ShapeDtypeStruct((Bp, 128), s_t.dtype),
        grid_spec=pltpu.PrefetchScalarGridSpec(
            num_scalar_prefetch=0,
            grid=grid,
            in_specs=[
                pl.BlockSpec((tm, 128), lambda i: (i, 0)),   # s_t (packed)
                pl.BlockSpec((tm, 128), lambda i: (i, 0)),   # s_g (packed)
                # Constant index_map -> fetched once, resident across steps.
                pl.BlockSpec((128, 128), lambda i: (0, 0)),  # weight/segments
                pl.BlockSpec(memory_space=pltpu.MemorySpace.SMEM),  # bias
            ],
            out_specs=pl.BlockSpec((tm, 128), lambda i: (i, 0)),
        ),
        compiler_params=pltpu.CompilerParams(
            # Row-block axis is independent -> shardable across TensorCores.
            dimension_semantics=("parallel",),
        ),
    )(st_p, sg_p, wseg, bias_1d)

    return out_p.reshape(Bpad, D)[:B]


def _interest_xla(s_t, s_g, weight, bias):
    """Plain fused XLA expression (exact elementwise D->1 dot)."""
    w = jnp.asarray(weight, s_t.dtype).reshape(1, -1)
    b = jnp.asarray(bias, s_t.dtype).reshape(())
    logit = jnp.sum(s_t * w, axis=-1, keepdims=True) + b
    gamma = jax.nn.sigmoid(logit)
    return s_g + gamma * (s_t - s_g)


def interest(s_t, s_g, weight, bias, *, min_kernel_batch=4096):
    """Dispatcher: small batches / odd feature widths use the fused XLA path."""
    B, D = s_t.shape
    if B < min_kernel_batch or D > 128 or 128 % D != 0:
        return _interest_xla(s_t, s_g, weight, bias)
    return interest_forward(s_t, s_g, weight, bias)


if __name__ == "__main__":
    # cfg.model.head_num = 4, cfg.model.head_dim = 8  ->  news_dim = 32
    head_num, head_dim = 4, 8
    news_dim = head_num * head_dim
    batch = 4096            # packs to (1024, 128); tm = 256 -> grid = (4,)

    key = jax.random.PRNGKey(0)
    k_st, k_sg, k_w, k_b = jax.random.split(key, 4)

    s_t = jax.random.normal(k_st, (batch, news_dim), dtype=jnp.float32)
    s_g = jax.random.normal(k_sg, (batch, news_dim), dtype=jnp.float32)

    # Deterministic synthetic parameters for nn.Linear(news_dim, 1).
    weight = jax.random.normal(k_w, (1, news_dim), dtype=jnp.float32) * 0.1
    bias = jax.random.normal(k_b, (1,), dtype=jnp.float32) * 0.1

    def reference(st, sg):
        # Exact elementwise f32 reference of the PyTorch module's math.
        logit = jnp.sum(st * weight.reshape(1, -1), axis=-1, keepdims=True) + bias[0]
        gamma = jax.nn.sigmoid(logit)
        return gamma * st + (1.0 - gamma) * sg

    u_ref = reference(s_t, s_g)

    # Tolerance covers FP reassociation and the MXU pass decomposition of the
    # f32 segment matmul; genuine layout/weight bugs give O(0.1 .. 1) errors.
    TOL = dict(atol=1e-2, rtol=1e-2)

    # 1) Pallas kernel path (multi-step grid, lane-dense packed layout).
    u = jax.block_until_ready(interest_forward(s_t, s_g, weight, bias))
    assert u.shape == (batch, news_dim)
    assert jnp.allclose(u, u_ref, **TOL), "kernel mismatch vs reference"

    # 2) Ragged batch (not a multiple of the packing factor) through the kernel.
    b2 = 70
    u2 = jax.block_until_ready(interest_forward(s_t[:b2], s_g[:b2], weight, bias))
    assert u2.shape == (b2, news_dim)
    assert jnp.allclose(u2, u_ref[:b2], **TOL), "ragged-batch mismatch"

    # 3) Dispatcher: large batch -> kernel, tiny batch -> fused XLA fallback.
    u3 = jax.block_until_ready(interest(s_t, s_g, weight, bias))
    assert jnp.allclose(u3, u_ref, **TOL), "dispatch (kernel) mismatch"
    u4 = jax.block_until_ready(interest(s_t[:37], s_g[:37], weight, bias))
    assert jnp.allclose(u4, u_ref[:37], atol=1e-5, rtol=1e-5), "dispatch (xla) mismatch"

    print("KERNEL_OK")
</pallas_src>

<mosaic_0001>
module attributes {stable_mosaic.version = 11 : i64} {
  func.func @_interest_kernel(%arg0: i32, %arg1: memref<256x128xf32, #tpu.memory_space<vmem>>, %arg2: memref<256x128xf32, #tpu.memory_space<vmem>>, %arg3: memref<128x128xf32, #tpu.memory_space<vmem>>, %arg4: memref<1xf32, #tpu.memory_space<smem>>, %arg5: memref<256x128xf32, #tpu.memory_space<vmem>>) attributes {dimension_semantics = [#tpu.dimension_semantics<parallel>], iteration_bounds = array<i64: 4>, scalar_prefetch = 0 : i64, scratch_operands = 0 : i64, tpu.core_type = #tpu.core_type<tc>, window_params = [{transform_indices = @transform_0, window_bounds = array<i64: 256, 128>}, {transform_indices = @transform_1, window_bounds = array<i64: 256, 128>}, {pipeline_mode = #tpu.pipeline_mode<synchronous>, transform_indices = @transform_2, window_bounds = array<i64: 128, 128>}, {transform_indices = @transform_3, window_bounds = array<i64: 1>}, {transform_indices = @transform_4, window_bounds = array<i64: 256, 128>}]} {
    %c0 = arith.constant 0 : index
    %c0_0 = arith.constant 0 : index
    %0 = vector.load %arg1[%c0, %c0_0] : memref<256x128xf32, #tpu.memory_space<vmem>>, vector<256x128xf32>
    %c0_1 = arith.constant 0 : index
    %c0_2 = arith.constant 0 : index
    %1 = vector.load %arg2[%c0_1, %c0_2] : memref<256x128xf32, #tpu.memory_space<vmem>>, vector<256x128xf32>
    %c0_3 = arith.constant 0 : index
    %2 = memref.load %arg4[%c0_3] : memref<1xf32, #tpu.memory_space<smem>>
    %c0_4 = arith.constant 0 : index
    %c0_5 = arith.constant 0 : index
    %3 = vector.load %arg3[%c0_4, %c0_5] : memref<128x128xf32, #tpu.memory_space<vmem>>, vector<128x128xf32>
    %cst = arith.constant dense<0.000000e+00> : vector<256x128xf32>
    %4 = tpu.matmul %0, %3, %cst {dimension_numbers = #tpu.dot_dimension_numbers<[1], [0], [0], [1], [0, 0, 1, 1], [], []>} : vector<256x128xf32>, vector<128x128xf32>, vector<256x128xf32> -> vector<256x128xf32>
    %5 = vector.broadcast %2 : f32 to vector<256x128xf32>
    %6 = arith.addf %4, %5 : vector<256x128xf32>
    %7 = arith.negf %6 : vector<256x128xf32>
    %8 = math.exp %7 : vector<256x128xf32>
    %cst_6 = arith.constant 1.000000e+00 : f32
    %9 = vector.broadcast %cst_6 : f32 to vector<256x128xf32>
    %10 = arith.addf %9, %8 : vector<256x128xf32>
    %11 = arith.divf %9, %10 : vector<256x128xf32>
    %12 = arith.subf %0, %1 : vector<256x128xf32>
    %13 = arith.mulf %11, %12 : vector<256x128xf32>
    %14 = arith.addf %1, %13 : vector<256x128xf32>
    %c0_7 = arith.constant 0 : index
    %c0_8 = arith.constant 0 : index
    %15 = vector.load %arg5[%c0_7, %c0_8] : memref<256x128xf32, #tpu.memory_space<vmem>>, vector<256x128xf32>
    tpu.vector_store %arg5[%c0_7, %c0_8], %14 {strides = array<i32>} : memref<256x128xf32, #tpu.memory_space<vmem>>, vector<256x128xf32>,
    return
  }
  func.func @transform_0(%arg0: i32) -> (i32, i32) {
    %c0_i32 = arith.constant 0 : i32
    %c0_i32_0 = arith.constant 0 : i32
    return %arg0, %c0_i32 : i32, i32
  }
  func.func @transform_1(%arg0: i32) -> (i32, i32) {
    %c0_i32 = arith.constant 0 : i32
    %c0_i32_0 = arith.constant 0 : i32
    return %arg0, %c0_i32 : i32, i32
  }
  func.func @transform_2(%arg0: i32) -> (i32, i32) {
    %c0_i32 = arith.constant 0 : i32
    %c0_i32_0 = arith.constant 0 : i32
    %c0_i32_1 = arith.constant 0 : i32
    return %c0_i32, %c0_i32_0 : i32, i32
  }
  func.func @transform_3(%arg0: i32) -> i32 {
    %c0_i32 = arith.constant 0 : i32
    %c0_i32_0 = arith.constant 0 : i32
    return %c0_i32 : i32
  }
  func.func @transform_4(%arg0: i32) -> (i32, i32) {
    %c0_i32 = arith.constant 0 : i32
    %c0_i32_0 = arith.constant 0 : i32
    return %arg0, %c0_i32 : i32, i32
  }
}

</mosaic_0001>

<bundles_post_ra>
// kernel: tpu_custom_call.1
= control target key start
LH: loop header
LB: loop body
LE: loop exit
PB: predicated region body
PF: predicated region fallthrough
CT: control target
= control target key end

     0   :  { %s2295_s0 = inlined_call_operand.hbm [shape: f32[1024,128], index: 0, kind: input, shape index: {}]   ;;  %s2296_s1 = inlined_call_operand.hbm [shape: f32[1024,128], index: 1, kind: input, shape index: {}]   ;;  %s2297_s2 = inlined_call_operand.hbm [shape: f32[128,128], index: 2, kind: input, shape index: {}]   ;;  %s2298_s3 = inlined_call_operand.<no memory space> [shape: f32[1], index: 3, kind: input, shape index: {}]   ;;  %s2299_s4 = inlined_call_operand.hbm [shape: f32[1024,128], index: 4, kind: output, shape index: {}]  }
   0x1   :  { %2320 = sst [smem:[#allocation28_spill]] %s2295_s0 }
   0x2   :  { %2321 = sst [smem:[#allocation29_spill]] %s2297_s2 }
   0x3   :  { %9 = sst [smem:[#allocation2]] %s2298_s3 }
   0x4   :  { %10 = vsyncpa [#allocation4], 0 }
   0x5   :  { %12 = vsyncpa [#allocation4 + $0x1], 0 }
   0x6   :  { %13 = vsyncpa [#allocation7], 0 }
   0x7   :  { %15 = vsyncpa [#allocation7 + $0x1], 0 }
   0x8   :  { %16 = vsyncpa [#allocation5], 0 }
   0x9   :  { %18 = vsyncpa [#allocation5 + $0x1], 0  ;;  %s1645_s17 = smov 0   ;;  %s1647_s18 = smov 0  }
   0xa   :  { %s1649_s19 = smov 0   ;;  %s1651_s20 = smov 0  }
   0xb LB: > { %s1666_s3 = sadd.s32 4294967295, %s1607_s20   ;;  %s1020_s21 = sadd.s32 4294967294, %s1607_s20   ;;  %s1607_s20 = sphi %s1651_s20, %s2382_s20   ;;  %s1603_s19 = sphi %s1649_s19, %s2381_s19   ;;  %s1599_s18 = sphi %s1647_s18, %s2380_s18   ;;  %s1595_s17 = sphi %s1645_s17, %s2379_s17  }
   0xc   : > { %p44_p0 = scmp.ne.s32.totalorder %s1599_s18, %s1595_s17  ;;  %p2300_p1 = scmp.eq.s32.totalorder %s1666_s3, 0 }
   0xd   : > { %p142_p3 = scmp.eq.s32.totalorder %s1020_s21, 3  ;;  %p1021_p5 = scmp.ge.s32.totalorder %s1607_s20, 1 }
   0xe   : > { %p1675_p4 = por %p2300_p1, %p44_p0  ;;  %p149_p7 = scmp.lt.s32.totalorder %s1607_s20, 5 }
   0xf   : > { %p1680_p6 = por %p142_p3, %p44_p0  ;;  %s1609_s25 = smov [#allocation8]  }
  0x10   : > { %s2322_s22 = scalar_select %p1675_p4, 1, 0 }
  0x11   : > { %s2323_s23 = scalar_select %p1680_p6, 1, 0 }
  0x12   : > { %p1685_p8 = pnand %p1021_p5, %p149_p7  ;;  %s161_s26 = sshll.u32 %s1609_s25, 4  ;;  %s162_s26 = int_to_ptr.vmem [resolvable:$true] %s161_s26 }
  0x13   : > { %s1698_s28 = sadd.s32 1, %s1607_s20   ;;  %s31_s29 = sadd.s32 1, %s1603_s19 }
  0x14   : > { %s2324_s24 = scalar_select %p1685_p8, 1, 0 }
  0x15   : > { %p1261_p9 = pneg %p1685_p8  ;;  %s28_s30 = ssub.s32 %s1607_s20, %s1698_s28 }
  0x16   : > { %s2326_s2 = sld [smem:[#allocation29_spill]] }
  0x17   : > { %p1693_p10 = pnand %p1261_p9, %p2300_p1 }
  0x19   : > { %p1447_p12 = pneg %p1693_p10 }
  0x1c   : > { %s1445_s7 = scalar_lea.hbm %s2326_s2, 2048 }
  0x1d   : > { %p1446_p11 = scmp.ne.s32.totalorder %s2326_s2, %s1445_s7  ;;  %p1452_p3 = scmp.lt.u32.totalorder %s1445_s7, %s2326_s2 }
  0x1f   : > { %p1448_p13 = pnand %p1447_p12, %p1446_p11 }
  0x21   : > { %p1449_p0 = pneg %p1448_p13 }
  0x23   : > { %p1454_p5 = pnand %p1452_p3, %p1449_p0 }
  0x25   : > { %1457 = shalt.err (!%p1454_p5)
}
  0x26   : > { %s1458_s12 = scalar_lea.vmem %s162_s26, 2048  ;;  %p1466_p2 = scmp.lt.s32.totalorder %s162_s26, %s162_s26 }
  0x27   : > { %p1459_p7 = scmp.ne.s32.totalorder %s162_s26, %s1458_s12  ;;  %p1467_p6 = scmp.lt.s32.totalorder %s1458_s12, %s1458_s12 }
  0x29   : > { %p1461_p9 = pnand %p1459_p7, %p1447_p12  ;;  %p1468_p4 = por %p1467_p6, %p1466_p2 }
  0x2b   : > { %p1462_p1 = pneg %p1461_p9 }
  0x2d   : > { %p1469_p8 = pnand %p1468_p4, %p1462_p1 }
  0x2f   : > { %1472 = shalt.err (!%p1469_p8)
}
  0x30   : > { %s2303_s13 = smov 128   ;;  %s2305_s14 = smov 8  }
  0x31   : > { %1264 = dma.hbm_to_vmem [thread:$0]  (!%p1693_p10), %s2326_s2, 2048, %s162_s26, [#allocation7], %s2303_s13, %s2303_s13, %s2305_s14  }
  0x32   : > { %p29_p1 = scmp.eq.s32.totalorder %s28_s30, 0  ;;  %p38_p2 = scmp.ne.s32.totalorder %s1603_s19, %s1599_s18 }
  0x33   : > { %p39_p4 = scmp.eq.s32.totalorder %s1607_s20, 0  ;;  %p1277_p6 = scmp.lt.s32.totalorder %s1607_s20, 4 }
  0x34   : > { %s1727_s21 = scalar_select %p29_p1, %s1603_s19, %s31_s29  }
  0x35   : > { %p40_p8 = por %p39_p4, %p38_p2  ;;  %p2327_p11 = scmp.eq.s32.totalorder %s1666_s3, 3 }
  0x36   : > { %s178_s27 = sand.u32 1, %s1603_s19   ;;  %s1072_s5 = sshll.u32 %s1607_s20, 12 }
  0x37   : > { %p1731_p12 = por %p2327_p11, %p38_p2  ;;  %s1737_s6 = sshll.u32 %s178_s27, 8 }
  0x38   : > { %s2329_s0 = sld [smem:[#allocation28_spill]]  ;;  %s182_s29 = scalar_lea.vmem [#allocation3], %s1737_s6 }
  0x39   : > { %s189_s30 = sshll.u32 %s182_s29, 4  ;;  %p1745_p10 = pnand %p1277_p6, %p40_p8  ;;  %s1749_s30 = int_to_ptr.vmem [resolvable:$true] %s189_s30 }
  0x3a   : > { %s1754_s12 = scalar_lea.hbm %s2296_s1, %s1072_s5  ;;  %s1756_s15 = scalar_lea.sflag [#allocation4], %s178_s27 }
  0x3b   : > { %p1475_p0 = pneg %p1745_p10 }
  0x3e   : > { %s1742_s26 = scalar_lea.hbm %s2329_s0, %s1072_s5  ;;  %s1478_s29 = scalar_lea.hbm %s2329_s0, 16384 }
  0x3f   : > { %s1473_s16 = scalar_lea.hbm %s1742_s26, 4096  ;;  %p1479_p7 = scmp.lt.u32.totalorder %s1742_s26, %s2329_s0 }
  0x40   : > { %p1474_p13 = scmp.ne.s32.totalorder %s1742_s26, %s1473_s16  ;;  %p1480_p9 = scmp.lt.u32.totalorder %s1478_s29, %s1473_s16 }
  0x41   : > { %p1482_p2 = scmp.lt.u32.totalorder %s1473_s16, %s1742_s26 }
  0x42   : > { %p1476_p3 = pnand %p1475_p0, %p1474_p13  ;;  %p1481_p1 = por %p1480_p9, %p1479_p7 }
  0x44   : > { %p1477_p5 = pneg %p1476_p3  ;;  %p1483_p4 = por %p1482_p2, %p1481_p1 }
  0x46   : > { %p1484_p6 = pnand %p1483_p4, %p1477_p5 }
  0x48   : > { %1487 = shalt.err (!%p1484_p6)
}
  0x49   : > { %s1488_s27 = scalar_lea.vmem %s1749_s30, 4096  ;;  %s1612_s5 = smov [#allocation3]  }
  0x4a   : > { %p1489_p8 = scmp.ne.s32.totalorder %s1749_s30, %s1488_s27  ;;  %s1493_s10 = sshll.u32 %s1612_s5, 4  ;;  %s1494_s10 = int_to_ptr.vmem [resolvable:$false] %s1493_s10 }
  0x4b   : > { %s1495_s13 = scalar_lea.vmem %s1494_s10, 8192  ;;  %p1496_p3 = scmp.lt.s32.totalorder %s1749_s30, %s1494_s10 }
  0x4c   : > { %p1491_p11 = pnand %p1489_p8, %p1475_p0  ;;  %p1497_p7 = scmp.lt.s32.totalorder %s1495_s13, %s1488_s27 }
  0x4e   : > { %p1492_p13 = pneg %p1491_p11  ;;  %p1498_p9 = por %p1497_p7, %p1496_p3 }
  0x50   : > { %p1499_p1 = pnand %p1498_p9, %p1492_p13 }
  0x52   : > { %1502 = shalt.err (!%p1499_p1)
}
  0x53   : > { %s2331_s14 = smov 8   ;;  %s2332_s11 = smov 128  }
  0x54   : > { %1268 = dma.hbm_to_vmem [thread:$0]  (!%p1745_p10), %s1742_s26, 4096, %s1749_s30, %s1756_s15, %s2332_s11, %s2332_s11, %s2331_s14  }
  0x55   : > { %s203_s16 = scalar_lea.vmem [#allocation6], %s1737_s6  ;;  %s199_s8 = sand.u32 1, %s1607_s20  }
  0x56   : > { %s210_s7 = sshll.u32 %s203_s16, 4  ;;  %s1791_s29 = scalar_lea.sflag [#allocation7], %s199_s8  ;;  %s1789_s7 = int_to_ptr.vmem [resolvable:$true] %s210_s7 }
  0x57   : > { %s1503_s27 = scalar_lea.hbm %s1754_s12, 4096  ;;  %s1508_s13 = scalar_lea.hbm %s2296_s1, 16384 }
  0x58   : > { %p1504_p5 = scmp.ne.s32.totalorder %s1754_s12, %s1503_s27  ;;  %p1509_p6 = scmp.lt.u32.totalorder %s1754_s12, %s2296_s1 }
  0x59   : > { %p1510_p8 = scmp.lt.u32.totalorder %s1508_s13, %s1503_s27  ;;  %p1512_p13 = scmp.lt.u32.totalorder %s1503_s27, %s1754_s12 }
  0x5a   : > { %p1506_p2 = pnand %p1504_p5, %p1475_p0 }
  0x5b   : > { %p1511_p11 = por %p1510_p8, %p1509_p6 }
  0x5c   : > { %p1507_p4 = pneg %p1506_p2 }
  0x5d   : > { %p1513_p3 = por %p1512_p13, %p1511_p11 }
  0x5f   : > { %p1514_p7 = pnand %p1513_p3, %p1507_p4 }
  0x61   : > { %1517 = shalt.err (!%p1514_p7)
}
  0x62   : > { %s1518_s6 = scalar_lea.vmem %s1789_s7, 4096  ;;  %s1613_s26 = smov [#allocation6]  }
  0x63   : > { %p1519_p9 = scmp.ne.s32.totalorder %s1789_s7, %s1518_s6  ;;  %s1523_s30 = sshll.u32 %s1613_s26, 4  ;;  %s1524_s30 = int_to_ptr.vmem [resolvable:$false] %s1523_s30 }
  0x64   : > { %s1525_s0 = scalar_lea.vmem %s1524_s30, 8192  ;;  %p1526_p2 = scmp.lt.s32.totalorder %s1789_s7, %s1524_s30 }
  0x65   : > { %p1521_p1 = pnand %p1519_p9, %p1475_p0  ;;  %p1527_p6 = scmp.lt.s32.totalorder %s1525_s0, %s1518_s6 }
  0x67   : > { %p1522_p5 = pneg %p1521_p1  ;;  %p1528_p8 = por %p1527_p6, %p1526_p2 }
  0x69   : > { %p1529_p11 = pnand %p1528_p8, %p1522_p5 }
  0x6b   : > { %1532 = shalt.err (!%p1529_p11)
}
  0x6c   : > { %1271 = dma.hbm_to_vmem [thread:$0]  (!%p1745_p10), %s1754_s12, 4096, %s1789_s7, %s1791_s29, %s2332_s11, %s2332_s11, %s2331_s14  }
  0x6d   : > { %p2333_p0 = scmp.ne.s32.totalorder %s2324_s24, 0 }
  0x6f   : > { %222 = sbr.rel (%p2333_p0) target bundleno = 479 (0x1df), region = 36 }
  0x76   : > { %s1823_s2 = sand.u32 1, %s1599_s18   ;;  %p2334_p4 = scmp.ne.s32.totalorder %s2322_s22, 0 }
  0x77   : > { %s1826_s15 = sshll.u32 %s1823_s2, 8  ;;  %s225_s9 = scalar_lea.sflag [#allocation4], %s1823_s2 }
  0x78   : > { %s1830_s16 = scalar_lea.vmem [#allocation3], %s1826_s15 }
  0x79   : > { %1578 = dma.done.wait (%p2334_p4), %s225_s9, 4096  }
  0x7a   : > { %1580 = vsyncadd (%p2334_p4), %s225_s9, 4294963200  ;;  %s233_s24 = sand.u32 1, %s1666_s3   ;;  %s1838_s14 = scalar_lea.vmem [#allocation6], %s1826_s15 }
  0x7b   : > { %s234_s12 = scalar_lea.sflag [#allocation7], %s233_s24 }
  0x7c   : > { %1582 = dma.done.wait (%p2334_p4), %s234_s12, 4096  }
  0x7d   : > { %1584 = vsyncadd (%p2334_p4), %s234_s12, 4294963200  ;;  %p2335_p10 = scmp.eq.s32.totalorder %s1666_s3, 0 }
  0x7f   : > { %1586 = dma.done.wait (%p2335_p10), [#allocation7], 2048   ;;  %p2336_p13 = pmov %p2335_p10 }
  0x80   : > { %v339_v0 = vld [vmem:[#allocation8] sm:$0xff]  ;;  %v340_v1 = vld [vmem:[#allocation8 + $0x8] sm:$0xff]  ;;  %v341_v2 = vld [vmem:[#allocation8 + $0x10] sm:$0xff]  ;;  %s338_s22 = sld [smem:[#allocation2]]  ;;  %s2097_s11 = scalar_lea.vmem [#allocation9], %s1826_s15 }
  0x81   : > { %1588 = vsyncadd (%p2336_p13), [#allocation7], 4294965248  ;;  %v1203_v3 = vpack.c.bf16 %v340_v1, %v339_v0  ;;  %v342_v4 = vld [vmem:[#allocation8 + $0x18] sm:$0xff]  ;;  %v343_v6 = vld [vmem:[#allocation8 + $0x20] sm:$0xff]  ;;  %s1074_s7 = sshll.u32 %s1666_s3, 12  ;;  %s915_s8 = sshll.u32 %s2097_s11, 4  ;;  %s2249_s8 = int_to_ptr.vmem [resolvable:$true] %s915_s8 }
  0x82   : > { %v1207_v5 = vpack.c.bf16 %v342_v4, %v341_v2  ;;  %v344_v7 = vld [vmem:[#allocation8 + $0x28] sm:$0xff]  ;;  %v1849_v9 = vld [vmem:[%s1830_s16] sm:$0xff]  ;;  %v345_v10 = vld [vmem:[#allocation8 + $0x30] sm:$0xff]  ;;  %s2247_s5 = scalar_lea.hbm %s2299_s4, %s1074_s7  ;;  %s902_s3 = scalar_lea.sflag [#allocation5], %s1823_s2 }
  0x83   : > { %1204 = vmatprep.subr.bf16.mxu0 %v1203_v3  ;;  %1235 = vmatprep.subr.bf16.mxu1 %v1203_v3  ;;  %v1211_v8 = vpack.c.bf16 %v344_v7, %v343_v6  ;;  %v346_v11 = vld [vmem:[#allocation8 + $0x38] sm:$0xff]  ;;  %v1853_v12 = vld [vmem:[%s1830_s16 + $0x80] sm:$0xff]  ;;  %v348_v15 = vld [vmem:[#allocation8 + $0x48] sm:$0xff]  ;;  %s1533_s10 = scalar_lea.vmem %s2249_s8, 4096  ;;  %s1614_s13 = smov [#allocation9]  }
  0x84   : > { %1206 = vmatpush3.bf16.msra.mxu0 %v1203_v3  ;;  %1243 = vmatpush3.bf16.msra.mxu1 %v1203_v3  ;;  %v1215_v13 = vpack.c.bf16 %v346_v11, %v345_v10  ;;  %v347_v14 = vld [vmem:[#allocation8 + $0x40] sm:$0xff]  ;;  %v349_v17 = vld [vmem:[#allocation8 + $0x50] sm:$0xff]  ;;  %v350_v18 = vld [vmem:[#allocation8 + $0x58] sm:$0xff]  ;;  %p1534_p3 = scmp.ne.s32.totalorder %s2249_s8, %s1533_s10  ;;  %s1537_s6 = sshll.u32 %s1614_s13, 4  ;;  %s1538_s6 = int_to_ptr.vmem [resolvable:$false] %s1537_s6 }
  0x85   : > { %1208 = vmatprep.subr.bf16.mxu0 %v1207_v5  ;;  %1236 = vmatprep.subr.bf16.mxu1 %v1207_v5  ;;  %v1219_v16 = vpack.c.bf16 %v348_v15, %v347_v14  ;;  %v1223_v19 = vpack.c.bf16 %v350_v18, %v349_v17  ;;  %v351_v20 = vld [vmem:[#allocation8 + $0x60] sm:$0xff]  ;;  %v352_v21 = vld [vmem:[#allocation8 + $0x68] sm:$0xff]  ;;  %v353_v23 = vld [vmem:[#allocation8 + $0x70] sm:$0xff]  ;;  %s1539_s26 = scalar_lea.vmem %s1538_s6, 8192  ;;  %p1540_p1 = scmp.lt.s32.totalorder %s2249_s8, %s1538_s6 }
  0x86   : > { %1155 = vmatprep.mubr.f32.mxu0 %v1849_v9  ;;  %1179 = vmatprep.mubr.f32.mxu1 %v1853_v12  ;;  %v1227_v22 = vpack.c.bf16 %v352_v21, %v351_v20  ;;  %v354_v24 = vld [vmem:[#allocation8 + $0x78] sm:$0xff]  ;;  %v1857_v26 = vld [vmem:[%s1830_s16 + $0x8] sm:$0xff]  ;;  %v1863_v28 = vld [vmem:[%s1830_s16 + $0x10] sm:$0xff]  ;;  %v1976_v56 = vstv %s338_s22  ;;  %p1535_p7 = pnand %p1534_p3, %p1731_p12  ;;  %p1541_p5 = scmp.lt.s32.totalorder %s1539_s26, %s1533_s10 }
  0x87   : > { %v1231_v25 = vpack.c.bf16 %v354_v24, %v353_v23  ;;  %v1860_v27 = vld [vmem:[%s1830_s16 + $0x88] sm:$0xff]  ;;  %v1866_v29 = vld [vmem:[%s1830_s16 + $0x90] sm:$0xff]  ;;  %v1873_v30 = vld [vmem:[%s1830_s16 + $0x18] sm:$0xff] }
  0x88   : > { %1210 = vmatpush3.bf16.msra.mxu0 %v1207_v5  ;;  %1244 = vmatpush3.bf16.msra.mxu1 %v1207_v5  ;;  %v1876_v31 = vld [vmem:[%s1830_s16 + $0x98] sm:$0xff]  ;;  %v1879_v32 = vld [vmem:[%s1830_s16 + $0x20] sm:$0xff]  ;;  %v1889_v34 = vld [vmem:[%s1830_s16 + $0x28] sm:$0xff]  ;;  %p1536_p9 = pneg %p1535_p7  ;;  %p1542_p2 = por %p1541_p5, %p1540_p1 }
  0x89   : > { %1212 = vmatprep.subr.bf16.mxu0 %v1211_v8  ;;  %1237 = vmatprep.subr.bf16.mxu1 %v1211_v8  ;;  %v1882_v33 = vld [vmem:[%s1830_s16 + $0xa0] sm:$0xff]  ;;  %v1892_v35 = vld [vmem:[%s1830_s16 + $0xa8] sm:$0xff]  ;;  %v1895_v36 = vld [vmem:[%s1830_s16 + $0x30] sm:$0xff] }
  0x8a   : > { %v1898_v37 = vld [vmem:[%s1830_s16 + $0xb0] sm:$0xff]  ;;  %v1905_v38 = vld [vmem:[%s1830_s16 + $0x38] sm:$0xff]  ;;  %v1911_v40 = vld [vmem:[%s1830_s16 + $0x40] sm:$0xff]  ;;  %p1543_p6 = pnand %p1542_p2, %p1536_p9 }
  0x8b   : > { %v1908_v39 = vld [vmem:[%s1830_s16 + $0xb8] sm:$0xff]  ;;  %v1914_v41 = vld [vmem:[%s1830_s16 + $0xc0] sm:$0xff]  ;;  %v1921_v42 = vld [vmem:[%s1830_s16 + $0x48] sm:$0xff] }
  0x8c   : > { %1214 = vmatpush3.bf16.msra.mxu0 %v1211_v8  ;;  %1245 = vmatpush3.bf16.msra.mxu1 %v1211_v8  ;;  %v1924_v43 = vld [vmem:[%s1830_s16 + $0xc8] sm:$0xff]  ;;  %v1927_v44 = vld [vmem:[%s1830_s16 + $0x50] sm:$0xff]  ;;  %v1937_v46 = vld [vmem:[%s1830_s16 + $0x58] sm:$0xff] }
  0x8d   : > { %1216 = vmatprep.subr.bf16.mxu0 %v1215_v13  ;;  %1238 = vmatprep.subr.bf16.mxu1 %v1215_v13  ;;  %2337 = vst [vmem:[#allocation14_spill] sm:$0xff] %v1924_v43  ;;  %2338 = vst [vmem:[#allocation15_spill] sm:$0xff] %v1927_v44  ;;  %v1930_v45 = vld [vmem:[%s1830_s16 + $0xd0] sm:$0xff]  ;;  %v1940_v47 = vld [vmem:[%s1830_s16 + $0xd8] sm:$0xff] }
  0x8e   : > { %2339 = vst [vmem:[#allocation16_spill] sm:$0xff] %v1930_v45  ;;  %2340 = vst [vmem:[#allocation17_spill] sm:$0xff] %v1937_v46  ;;  %v1943_v48 = vld [vmem:[%s1830_s16 + $0x60] sm:$0xff]  ;;  %v1953_v50 = vld [vmem:[%s1830_s16 + $0x68] sm:$0xff] }
  0x8f   : > { %2341 = vst [vmem:[#allocation18_spill] sm:$0xff] %v1940_v47  ;;  %2342 = vst [vmem:[#allocation19_spill] sm:$0xff] %v1943_v48  ;;  %v1946_v49 = vld [vmem:[%s1830_s16 + $0xe0] sm:$0xff]  ;;  %v1956_v51 = vld [vmem:[%s1830_s16 + $0xe8] sm:$0xff] }
  0x90   : > { %1218 = vmatpush3.bf16.msra.mxu0 %v1215_v13  ;;  %1246 = vmatpush3.bf16.msra.mxu1 %v1215_v13  ;;  %2343 = vst [vmem:[#allocation20_spill] sm:$0xff] %v1946_v49  ;;  %2344 = vst [vmem:[#allocation21_spill] sm:$0xff] %v1953_v50  ;;  %v1959_v52 = vld [vmem:[%s1830_s16 + $0x70] sm:$0xff]  ;;  %v1969_v54 = vld [vmem:[%s1830_s16 + $0x78] sm:$0xff] }
  0x91   : > { %1220 = vmatprep.subr.bf16.mxu0 %v1219_v16  ;;  %1239 = vmatprep.subr.bf16.mxu1 %v1219_v16  ;;  %2345 = vst [vmem:[#allocation22_spill] sm:$0xff] %v1956_v51  ;;  %2346 = vst [vmem:[#allocation23_spill] sm:$0xff] %v1959_v52  ;;  %v1962_v53 = vld [vmem:[%s1830_s16 + $0xf0] sm:$0xff]  ;;  %v1972_v55 = vld [vmem:[%s1830_s16 + $0xf8] sm:$0xff] }
  0x92   : > { %2347 = vst [vmem:[#allocation24_spill] sm:$0xff] %v1962_v53  ;;  %2348 = vst [vmem:[#allocation25_spill] sm:$0xff] %v1969_v54 }
  0x93   : > { %2349 = vst [vmem:[#allocation26_spill] sm:$0xff] %v1972_v55 }
  0x94   : > { %1222 = vmatpush3.bf16.msra.mxu0 %v1219_v16  ;;  %1247 = vmatpush3.bf16.msra.mxu1 %v1219_v16 }
  0x95   : > { %1224 = vmatprep.subr.bf16.mxu0 %v1223_v19  ;;  %1240 = vmatprep.subr.bf16.mxu1 %v1223_v19 }
  0x98   : > { %1226 = vmatpush3.bf16.msra.mxu0 %v1223_v19  ;;  %1248 = vmatpush3.bf16.msra.mxu1 %v1223_v19 }
  0x99   : > { %1228 = vmatprep.subr.bf16.mxu0 %v1227_v22  ;;  %1241 = vmatprep.subr.bf16.mxu1 %v1227_v22 }
  0x9c   : > { %1230 = vmatpush3.bf16.msra.mxu0 %v1227_v22  ;;  %1249 = vmatpush3.bf16.msra.mxu1 %v1227_v22 }
  0x9d   : > { %1232 = vmatprep.subr.bf16.mxu0 %v1231_v25  ;;  %1242 = vmatprep.subr.bf16.mxu1 %v1231_v25 }
  0xa0   : > { %1234 = vmatpush3.bf16.msra.mxu0 %v1231_v25  ;;  %1250 = vmatpush3.bf16.msra.mxu1 %v1231_v25 }
  0xa3   : > { %1156 = vmatmul.mubr.f32.vlgmr.msra.gmra.mrb[0].mxu0 %v1857_v26  ;;  %1180 = vmatmul.mubr.f32.vlgmr.msra.gmra.mrb[0].mxu1 %v1860_v27 }
  0xa4   : > { %1158 = vmatprep.mubr.f32.mxu0 %v1863_v28  ;;  %1182 = vmatprep.mubr.f32.mxu1 %v1866_v29 }
  0xa7   : > { %1159 = vmatmul.mubr.f32.gmra.mrb[2].mxu0 %v1873_v30  ;;  %1183 = vmatmul.mubr.f32.gmra.mrb[2].mxu1 %v1876_v31 }
  0xa8   : > { %1161 = vmatprep.mubr.f32.mxu0 %v1879_v32  ;;  %1185 = vmatprep.mubr.f32.mxu1 %v1882_v33 }
  0xab   : > { %1162 = vmatmul.mubr.f32.gmra.mrb[4].mxu0 %v1889_v34  ;;  %1186 = vmatmul.mubr.f32.gmra.mrb[4].mxu1 %v1892_v35 }
  0xac   : > { %1164 = vmatprep.mubr.f32.mxu0 %v1895_v36  ;;  %1188 = vmatprep.mubr.f32.mxu1 %v1898_v37 }
  0xaf   : > { %1165 = vmatmul.mubr.f32.gmra.mrb[6].mxu0 %v1905_v38  ;;  %1189 = vmatmul.mubr.f32.gmra.mrb[6].mxu1 %v1908_v39 }
  0xb0   : > { %1167 = vmatprep.mubr.f32.mxu0 %v1911_v40  ;;  %1191 = vmatprep.mubr.f32.mxu1 %v1914_v41 }
  0xb3   : > { %1168 = vmatmul.mubr.f32.gmra.mrb[8].mxu0 %v1921_v42  ;;  %1192 = vmatmul.mubr.f32.gmra.mrb[8].mxu1 %v1924_v43 }
  0xb4   : > { %1170 = vmatprep.mubr.f32.mxu0 %v1927_v44  ;;  %1194 = vmatprep.mubr.f32.mxu1 %v1930_v45 }
  0xb7   : > { %1171 = vmatmul.mubr.f32.gmra.mrb[10].mxu0 %v1937_v46  ;;  %1195 = vmatmul.mubr.f32.gmra.mrb[10].mxu1 %v1940_v47 }
  0xb8   : > { %1173 = vmatprep.mubr.f32.mxu0 %v1943_v48  ;;  %1197 = vmatprep.mubr.f32.mxu1 %v1946_v49 }
  0xbb   : > { %1174 = vmatmul.mubr.f32.gmra.mrb[12].mxu0 %v1953_v50  ;;  %1198 = vmatmul.mubr.f32.gmra.mrb[12].mxu1 %v1956_v51 }
  0xbc   : > { %1176 = vmatprep.mubr.f32.mxu0 %v1959_v52  ;;  %1200 = vmatprep.mubr.f32.mxu1 %v1962_v53 }
  0xbf   : > { %1177 = vmatmul.mubr.f32.gmra.mrb[14].mxu0 %v1969_v54  ;;  %1201 = vmatmul.mubr.f32.gmra.mrb[14].mxu1 %v1972_v55 }
 0x176   : > { %v1157_v57 = vpop.f32.mrb[0].mxu0  ;;  %v1181_v58 = vpop.f32.mrb[0].mxu1 }
 0x177   : > { %v428_v59 = vadd.f32 %v1157_v57, %v1976_v56  ;;  %v508_v60 = vadd.f32 %v1181_v58, %v1976_v56  ;;  %v422_v61 = vpop.f32.mrb[1].mxu0  ;;  %v502_v62 = vpop.f32.mrb[1].mxu1 }
 0x178   : > { %v423_v63 = vadd.f32 %v422_v61, %v1976_v56  ;;  %v503_v0 = vadd.f32 %v502_v62, %v1976_v56 }
 0x179   : > { %v1036_v1 = vmul.f32 -1.442695, %v428_v59  ;;  %v1052_v2 = vmul.f32 -1.442695, %v508_v60 }
 0x17a   : > { %v1035_v3 = vmul.f32 -1.442695, %v423_v63  ;;  %v1051_v4 = vmul.f32 -1.442695, %v503_v0  ;;  %v1160_v5 = vpop.f32.mrb[2].mxu0  ;;  %v1184_v6 = vpop.f32.mrb[2].mxu1 }
 0x17b   : > { %1317 = vpow2.f32 %v1036_v1  ;;  %v438_v7 = vadd.f32 %v1160_v5, %v1976_v56  ;;  %v518_v8 = vadd.f32 %v1184_v6, %v1976_v56  ;;  %v432_v10 = vpop.f32.mrb[3].mxu0  ;;  %v512_v11 = vpop.f32.mrb[3].mxu1  ;;  %v1991_v0 = vld [vmem:[%s1838_s14] sm:$0xff]  ;;  %v2000_v5 = vld [vmem:[%s1838_s14 + $0x8] sm:$0xff] }
 0x17c   : > { %1319 = vpow2.f32 %v1052_v2  ;;  %v433_v13 = vadd.f32 %v432_v10, %v1976_v56  ;;  %v513_v14 = vadd.f32 %v512_v11, %v1976_v56  ;;  %v1994_v1 = vld [vmem:[%s1838_s14 + $0x80] sm:$0xff]  ;;  %v2003_v6 = vld [vmem:[%s1838_s14 + $0x88] sm:$0xff]  ;;  %v2009_v10 = vld [vmem:[%s1838_s14 + $0x90] sm:$0xff] }
 0x17d   : > { %1321 = vpow2.f32 %v1035_v3  ;;  %v1038_v15 = vmul.f32 -1.442695, %v438_v7  ;;  %v1054_v16 = vmul.f32 -1.442695, %v518_v8  ;;  %v2006_v8 = vld [vmem:[%s1838_s14 + $0x10] sm:$0xff] }
 0x17e   : > { %1323 = vpow2.f32 %v1051_v4  ;;  %v1037_v17 = vmul.f32 -1.442695, %v433_v13  ;;  %v1053_v18 = vmul.f32 -1.442695, %v513_v14  ;;  %v1163_v19 = vpop.f32.mrb[4].mxu0  ;;  %v1187_v20 = vpop.f32.mrb[4].mxu1 }
 0x17f   : > { %1325 = vpow2.f32 %v1038_v15  ;;  %v448_v21 = vadd.f32 %v1163_v19, %v1976_v56  ;;  %v528_v22 = vadd.f32 %v1187_v20, %v1976_v56  ;;  %v442_v23 = vpop.f32.mrb[5].mxu0  ;;  %v522_v24 = vpop.f32.mrb[5].mxu1  ;;  %v2043_v14 = vld [vmem:[%s1838_s14 + $0xa8] sm:$0xff] }
 0x180   : > { %1327 = vpow2.f32 %v1054_v16  ;;  %v443_v25 = vadd.f32 %v442_v23, %v1976_v56  ;;  %v523_v57 = vadd.f32 %v522_v24, %v1976_v56  ;;  %v2016_v16 = vld [vmem:[%s1838_s14 + $0x18] sm:$0xff]  ;;  %v2026_v23 = vld [vmem:[%s1838_s14 + $0x20] sm:$0xff] }
 0x181   : > { %1329 = vpow2.f32 %v1037_v17  ;;  %v1040_v58 = vmul.f32 -1.442695, %v448_v21  ;;  %v1056_v59 = vmul.f32 -1.442695, %v528_v22  ;;  %v2019_v17 = vld [vmem:[%s1838_s14 + $0x98] sm:$0xff]  ;;  %v2029_v24 = vld [vmem:[%s1838_s14 + $0xa0] sm:$0xff] }
 0x182   : > { %1331 = vpow2.f32 %v1053_v18  ;;  %v1039_v60 = vmul.f32 -1.442695, %v443_v25  ;;  %v1055_v61 = vmul.f32 -1.442695, %v523_v57  ;;  %v1166_v62 = vpop.f32.mrb[6].mxu0  ;;  %v1190_v63 = vpop.f32.mrb[6].mxu1 }
 0x183   : > { %1333 = vpow2.f32 %v1040_v58  ;;  %v458_v2 = vadd.f32 %v1166_v62, %v1976_v56  ;;  %v452_v3 = vpop.f32.mrb[7].mxu0  ;;  %v1997_v4 = vpop.f32.mrb[7].mxu1  ;;  %v2036_v62 = vld [vmem:[%s1838_s14 + $0x28] sm:$0xff] }
 0x184   : > { %1335 = vpow2.f32 %v1056_v59 }
 0x185   : > { %v1318_v7 = vpop.eup %1317  ;;  %1337 = vpow2.f32 %v1039_v60  ;;  %v1042_v11 = vmul.f32 -1.442695, %v458_v2 }
 0x186   : > { %v1320_v13 = vpop.eup %1319  ;;  %v678_v18 = vadd.f32 1.0, %v1318_v7  ;;  %1339 = vpow2.f32 %v1055_v61  ;;  %v1169_v19 = vpop.f32.mrb[8].mxu0 }
 0x187   : > { %v1322_v20 = vpop.eup %1321  ;;  %v694_v25 = vadd.f32 1.0, %v1320_v13  ;;  %1341 = vpow2.f32 %v1042_v11  ;;  %v1193_v57 = vpop.f32.mrb[8].mxu1  ;;  %v468_v51 = vadd.f32 %v1169_v19, %v1976_v56 }
 0x188   : > { %v462_v58 = vpop.f32.mrb[9].mxu0  ;;  %v1324_v59 = vpop.eup %1323  ;;  %1343 = vrcp.f32 %v678_v18  ;;  %v677_v2 = vadd.f32 1.0, %v1322_v20  ;;  %v2050_v20 = vld [vmem:[%s1838_s14 + $0x38] sm:$0xff] }
 0x189   : > { %v542_v7 = vpop.f32.mrb[9].mxu1  ;;  %v1326_v15 = vpop.eup %1325  ;;  %1345 = vrcp.f32 %v694_v25  ;;  %v693_v22 = vadd.f32 1.0, %v1324_v59  ;;  %v538_v25 = vadd.f32 %v1190_v63, %v1976_v56  ;;  %v533_v63 = vadd.f32 %v1997_v4, %v1976_v56 }
 0x18a   : > { %v1328_v60 = vpop.eup %1327  ;;  %1347 = vrcp.f32 %v677_v2  ;;  %v680_v21 = vadd.f32 1.0, %v1326_v15  ;;  %v1172_v53 = vpop.f32.mrb[10].mxu0  ;;  %v453_v2 = vadd.f32 %v452_v3, %v1976_v56  ;;  %v463_v45 = vadd.f32 %v462_v58, %v1976_v56 }
 0x18b   : > { %v1330_v13 = vpop.eup %1329  ;;  %1349 = vrcp.f32 %v693_v22  ;;  %v696_v52 = vadd.f32 1.0, %v1328_v60  ;;  %v1196_v59 = vpop.f32.mrb[10].mxu1  ;;  %v1058_v50 = vmul.f32 -1.442695, %v538_v25  ;;  %v1057_v47 = vmul.f32 -1.442695, %v533_v63 }
 0x18c   : > { %v472_v55 = vpop.f32.mrb[11].mxu0  ;;  %v1332_v54 = vpop.eup %1331  ;;  %1351 = vrcp.f32 %v680_v21  ;;  %v679_v18 = vadd.f32 1.0, %v1330_v13  ;;  %v548_v21 = vadd.f32 %v1193_v57, %v1976_v56  ;;  %v1041_v44 = vmul.f32 -1.442695, %v453_v2 }
 0x18d   : > { %v552_v15 = vpop.f32.mrb[11].mxu1  ;;  %v1334_v49 = vpop.eup %1333  ;;  %1353 = vrcp.f32 %v696_v52  ;;  %v695_v22 = vadd.f32 1.0, %v1332_v54  ;;  %v1043_v2 = vmul.f32 -1.442695, %v463_v45 }
 0x18e   : > { %v1336_v60 = vpop.eup %1335  ;;  %1355 = vrcp.f32 %v679_v18  ;;  %v682_v11 = vadd.f32 1.0, %v1334_v49  ;;  %v1175_v13 = vpop.f32.mrb[12].mxu0  ;;  %v543_v49 = vadd.f32 %v542_v7, %v1976_v56  ;;  %v1060_v46 = vmul.f32 -1.442695, %v548_v21 }
 0x18f   : > { %v1338_v61 = vpop.eup %1337  ;;  %1357 = vrcp.f32 %v695_v22  ;;  %v698_v3 = vadd.f32 1.0, %v1336_v60  ;;  %v1199_v48 = vpop.f32.mrb[12].mxu1  ;;  %v478_v22 = vadd.f32 %v1172_v53, %v1976_v56  ;;  %v1044_v60 = vmul.f32 -1.442695, %v468_v51 }
 0x190   : > { %v2065_v52 = vpop.f32.mrb[13].mxu0  ;;  %v1340_v54 = vpop.eup %1339  ;;  %1359 = vrcp.f32 %v682_v11  ;;  %v681_v4 = vadd.f32 1.0, %v1338_v61  ;;  %v2350_v61 = vsub.f32 %v1857_v26, %v2000_v5  ;;  %v2352_v51 = vsub.f32 %v1860_v27, %v2003_v6 }
 0x191   : > { %v2068_v18 = vpop.f32.mrb[13].mxu1  ;;  %v1342_v19 = vpop.eup %1341  ;;  %1361 = vrcp.f32 %v698_v3  ;;  %v697_v57 = vadd.f32 1.0, %v1340_v54  ;;  %v558_v3 = vadd.f32 %v1196_v59, %v1976_v56  ;;  %v2353_v59 = vsub.f32 %v1849_v9, %v1991_v0 }
 0x192   : > { %v1344_v25 = vpop.eup %1343  ;;  %1363 = vrcp.f32 %v681_v4  ;;  %v684_v58 = vadd.f32 1.0, %v1342_v19  ;;  %v2071_v43 = vpop.f32.mrb[14].mxu0  ;;  %v1059_v4 = vmul.f32 -1.442695, %v543_v49  ;;  %v473_v19 = vadd.f32 %v472_v55, %v1976_v56 }
 0x193   : > { %v1346_v11 = vpop.eup %1345  ;;  %v806_v7 = vmul.f32 %v1344_v25, %v2350_v61  ;;  %1365 = vrcp.f32 %v697_v57  ;;  %v2077_v54 = vpop.f32.mrb[14].mxu1  ;;  %v1046_v61 = vmul.f32 -1.442695, %v478_v22  ;;  %v553_v55 = vadd.f32 %v552_v15, %v1976_v56 }
 0x194   : > { %v2079_v63 = vpop.f32.mrb[15].mxu0  ;;  %v1348_v53 = vpop.eup %1347  ;;  %v822_v21 = vmul.f32 %v1346_v11, %v2352_v51  ;;  %1367 = vrcp.f32 %v684_v58  ;;  %v2354_v58 = vsub.f32 %v1853_v12, %v1994_v1  ;;  %v1062_v12 = vmul.f32 -1.442695, %v558_v3 }
 0x195   : > { %2351 = vst [vmem:[#allocation27_spill] sm:$0xff] %v2079_v63  ;;  %v2085_v26 = vpop.f32.mrb[15].mxu1  ;;  %v1350_v57 = vpop.eup %1349  ;;  %v838_v45 = vadd.f32 %v806_v7, %v2000_v5  ;;  %v805_v25 = vmul.f32 %v1348_v53, %v2353_v59  ;;  %1369 = vpow2.f32 %v1058_v50  ;;  %v2355_v50 = vsub.f32 %v1873_v30, %v2016_v16 }
 0x196   : > { %v1352_v63 = vpop.eup %1351  ;;  %v854_v27 = vadd.f32 %v822_v21, %v2003_v6  ;;  %v821_v49 = vmul.f32 %v1350_v57, %v2354_v58  ;;  %1371 = vpow2.f32 %v1041_v44  ;;  %v2356_v15 = vsub.f32 %v1876_v31, %v2019_v17 }
 0x197   : > { %v1354_v11 = vpop.eup %1353  ;;  %870 = vst [vmem:[%s2097_s11 + $0x8] sm:$0xff] %v838_v45  ;;  %v837_v9 = vadd.f32 %v805_v25, %v1991_v0  ;;  %v808_v5 = vmul.f32 %v1352_v63, %v2355_v50  ;;  %1373 = vpow2.f32 %v1057_v47  ;;  %v488_v7 = vadd.f32 %v1175_v13, %v1976_v56  ;;  %v2152_v50 = vld [vmem:[%s1838_s14 + $0x30] sm:$0xff] }
 0x198   : > { %v1356_v6 = vpop.eup %1355  ;;  %886 = vst [vmem:[%s2097_s11 + $0x88] sm:$0xff] %v854_v27  ;;  %v853_v44 = vadd.f32 %v821_v49, %v1994_v1  ;;  %v824_v22 = vmul.f32 %v1354_v11, %v2356_v15  ;;  %1375 = vpow2.f32 %v1044_v60  ;;  %v2357_v47 = vsub.f32 %v1863_v28, %v2006_v8  ;;  %v2160_v15 = vld [vmem:[%s1838_s14 + $0x40] sm:$0xff] }
 0x199   : > { %v1358_v0 = vpop.eup %1357  ;;  %869 = vst [vmem:[%s2097_s11] sm:$0xff] %v837_v9  ;;  %v840_v30 = vadd.f32 %v808_v5, %v2016_v16  ;;  %1377 = vpow2.f32 %v1060_v46  ;;  %v568_v1 = vadd.f32 %v1199_v48, %v1976_v56  ;;  %v2358_v60 = vsub.f32 %v1866_v29, %v2009_v10  ;;  %v2155_v5 = vld [vmem:[%s1838_s14 + $0xb0] sm:$0xff] }
 0x19a   : > { %v807_v3 = vmul.f32 %v1356_v6, %v2357_v47  ;;  %v1360_v63 = vpop.eup %1359  ;;  %885 = vst [vmem:[%s2097_s11 + $0x80] sm:$0xff] %v853_v44  ;;  %v856_v31 = vadd.f32 %v824_v22, %v2019_v17  ;;  %1379 = vpow2.f32 %v1043_v2  ;;  %v1045_v53 = vmul.f32 -1.442695, %v473_v19  ;;  %v329_v6 = vld [vmem:[%s1838_s14 + $0xb8] sm:$0xff]  ;;  %v2167_v47 = vld [vmem:[%s1838_s14 + $0xc0] sm:$0xff] }
 0x19b   : > { %v823_v13 = vmul.f32 %v1358_v0, %v2358_v60  ;;  %v1362_v16 = vpop.eup %1361  ;;  %872 = vst [vmem:[%s2097_s11 + $0x18] sm:$0xff] %v840_v30  ;;  %v2359_v46 = vsub.f32 %v1889_v34, %v2036_v62  ;;  %1381 = vpow2.f32 %v1059_v4  ;;  %v1061_v48 = vmul.f32 -1.442695, %v553_v55 }
 0x19c   : > { %v839_v28 = vadd.f32 %v807_v3, %v2006_v8  ;;  %v1364_v21 = vpop.eup %1363  ;;  %888 = vst [vmem:[%s2097_s11 + $0x98] sm:$0xff] %v856_v31  ;;  %v2360_v29 = vsub.f32 %v1892_v35, %v2043_v14  ;;  %1383 = vpow2.f32 %v1046_v61  ;;  %v1048_v19 = vmul.f32 -1.442695, %v488_v7  ;;  %v2171_v31 = vld [vmem:[%s1838_s14 + $0x48] sm:$0xff] }
 0x19d   : > { %v810_v51 = vmul.f32 %v1360_v63, %v2359_v46  ;;  %v855_v17 = vadd.f32 %v823_v13, %v2009_v10  ;;  %v1366_v57 = vpop.eup %1365  ;;  %v2361_v8 = vsub.f32 %v1879_v32, %v2026_v23  ;;  %1385 = vpow2.f32 %v1062_v12 }
 0x19e   : > { %v826_v2 = vmul.f32 %v1362_v16, %v2360_v29  ;;  %871 = vst [vmem:[%s2097_s11 + $0x10] sm:$0xff] %v839_v28  ;;  %v1064_v45 = vmul.f32 -1.442695, %v568_v1  ;;  %v1368_v59 = vpop.eup %1367  ;;  %v2362_v10 = vsub.f32 %v1882_v33, %v2029_v24  ;;  %1387 = vpow2.f32 %v1045_v53  ;;  %v2189_v29 = vld [vmem:[%s1838_s14 + $0x58] sm:$0xff] }
 0x19f   : > { %v842_v34 = vadd.f32 %v810_v51, %v2036_v62  ;;  %v809_v4 = vmul.f32 %v1364_v21, %v2361_v8  ;;  %887 = vst [vmem:[%s2097_s11 + $0x90] sm:$0xff] %v855_v17  ;;  %v1370_v61 = vpop.eup %1369  ;;  %v2363_v32 = vsub.f32 %v1905_v38, %v2050_v20  ;;  %1389 = vpow2.f32 %v1061_v48 }
 0x1a0   : > { %v858_v35 = vadd.f32 %v826_v2, %v2043_v14  ;;  %v825_v25 = vmul.f32 %v1366_v57, %v2362_v10  ;;  %v1372_v58 = vpop.eup %1371  ;;  %v700_v33 = vadd.f32 1.0, %v1370_v61  ;;  %1391 = vpow2.f32 %v1048_v19  ;;  %v2364_v19 = vld [vmem:[#allocation27_spill] sm:$0xff] }
 0x1a1   : > { %874 = vst [vmem:[%s2097_s11 + $0x28] sm:$0xff] %v842_v34  ;;  %v841_v62 = vadd.f32 %v809_v4, %v2026_v23  ;;  %v812_v27 = vmul.f32 %v1368_v59, %v2363_v32  ;;  %v1374_v49 = vpop.eup %1373  ;;  %v683_v23 = vadd.f32 1.0, %v1372_v58  ;;  %1393 = vpow2.f32 %v1064_v45 }
 0x1a2   : > { %890 = vst [vmem:[%s2097_s11 + $0xa8] sm:$0xff] %v858_v35  ;;  %v857_v14 = vadd.f32 %v825_v25, %v2029_v24  ;;  %v1376_v38 = vpop.eup %1375  ;;  %1395 = vrcp.f32 %v700_v33  ;;  %v699_v11 = vadd.f32 1.0, %v1374_v49  ;;  %v779_v0 = vsub.f32 %v1895_v36, %v2152_v50  ;;  %v2366_v25 = vld [vmem:[#allocation17_spill] sm:$0xff] }
 0x1a3   : > { %873 = vst [vmem:[%s2097_s11 + $0x20] sm:$0xff] %v841_v62  ;;  %v844_v55 = vadd.f32 %v812_v27, %v2050_v20  ;;  %v1378_v9 = vpop.eup %1377  ;;  %1397 = vrcp.f32 %v683_v23  ;;  %v686_v24 = vadd.f32 1.0, %v1376_v38  ;;  %v795_v30 = vsub.f32 %v1898_v37, %v2155_v5  ;;  %v333_v62 = vld [vmem:[%s1838_s14 + $0xd8] sm:$0xff] }
 0x1a4   : > { %889 = vst [vmem:[%s2097_s11 + $0xa0] sm:$0xff] %v857_v14  ;;  %v1380_v12 = vpop.eup %1379  ;;  %1399 = vrcp.f32 %v699_v11  ;;  %v702_v20 = vadd.f32 1.0, %v1378_v9  ;;  %v796_v63 = vsub.f32 %v1908_v39, %v329_v6  ;;  %v483_v13 = vadd.f32 %v2065_v52, %v1976_v56  ;;  %v316_v14 = vld [vmem:[%s1838_s14 + $0x50] sm:$0xff] }
 0x1a5   : > { %876 = vst [vmem:[%s2097_s11 + $0x38] sm:$0xff] %v844_v55  ;;  %v1382_v44 = vpop.eup %1381  ;;  %1401 = vrcp.f32 %v686_v24  ;;  %v685_v22 = vadd.f32 1.0, %v1380_v12  ;;  %v781_v36 = vsub.f32 %v1911_v40, %v2160_v15  ;;  %v563_v16 = vadd.f32 %v2068_v18, %v1976_v56  ;;  %v331_v40 = vld [vmem:[%s1838_s14 + $0xc8] sm:$0xff]  ;;  %v332_v55 = vld [vmem:[%s1838_s14 + $0xd0] sm:$0xff]  ;;  %v2367_v24 = vld [vmem:[#allocation18_spill] sm:$0xff] }
 0x1a6   : > { %v1384_v7 = vpop.eup %1383  ;;  %1403 = vrcp.f32 %v702_v20  ;;  %v701_v3 = vadd.f32 1.0, %v1382_v44  ;;  %v797_v39 = vsub.f32 %v1914_v41, %v2167_v47  ;;  %v498_v51 = vadd.f32 %v2071_v43, %v1976_v56  ;;  %v319_v20 = vld [vmem:[%s1838_s14 + $0x68] sm:$0xff] }
 0x1a7   : > { %v1386_v1 = vpop.eup %1385  ;;  %1405 = vrcp.f32 %v685_v22  ;;  %v688_v60 = vadd.f32 1.0, %v1384_v7  ;;  %v782_v48 = vsub.f32 %v1921_v42, %v2171_v31  ;;  %v578_v17 = vadd.f32 %v2077_v54, %v1976_v56  ;;  %v2365_v54 = vld [vmem:[#allocation14_spill] sm:$0xff]  ;;  %v2368_v7 = vld [vmem:[#allocation15_spill] sm:$0xff] }
 0x1a8   : > { %v1388_v53 = vpop.eup %1387  ;;  %1407 = vrcp.f32 %v701_v3  ;;  %v704_v37 = vadd.f32 1.0, %v1386_v1  ;;  %v1047_v2 = vmul.f32 -1.442695, %v483_v13  ;;  %v493_v43 = vadd.f32 %v2364_v19, %v1976_v56 }
 0x1a9   : > { %v1390_v28 = vpop.eup %1389  ;;  %1409 = vrcp.f32 %v688_v60  ;;  %v687_v46 = vadd.f32 1.0, %v1388_v53  ;;  %v1063_v34 = vmul.f32 -1.442695, %v563_v16  ;;  %v573_v8 = vadd.f32 %v2085_v26, %v1976_v56 }
 0x1aa   : > { %v1392_v52 = vpop.eup %1391  ;;  %1411 = vrcp.f32 %v704_v37  ;;  %v703_v21 = vadd.f32 1.0, %v1390_v28  ;;  %v798_v45 = vsub.f32 %v2365_v54, %v331_v40  ;;  %v1050_v35 = vmul.f32 -1.442695, %v498_v51  ;;  %v2370_v37 = vld [vmem:[#allocation21_spill] sm:$0xff] }
 0x1ab   : > { %v1394_v18 = vpop.eup %1393  ;;  %1413 = vrcp.f32 %v687_v46  ;;  %v690_v41 = vadd.f32 1.0, %v1392_v52  ;;  %v784_v61 = vsub.f32 %v2366_v25, %v2189_v29  ;;  %v1066_v27 = vmul.f32 -1.442695, %v578_v17 }
 0x1ac   : > { %v1396_v57 = vpop.eup %1395  ;;  %1415 = vrcp.f32 %v703_v21  ;;  %v706_v42 = vadd.f32 1.0, %v1394_v18  ;;  %v1049_v33 = vmul.f32 -1.442695, %v493_v43  ;;  %v1065_v11 = vmul.f32 -1.442695, %v573_v8 }
 0x1ad   : > { %v1398_v4 = vpop.eup %1397  ;;  %v828_v59 = vmul.f32 %v1396_v57, %v796_v63  ;;  %1417 = vrcp.f32 %v690_v41  ;;  %v800_v12 = vsub.f32 %v2367_v24, %v333_v62  ;;  %v2369_v63 = vld [vmem:[#allocation16_spill] sm:$0xff]  ;;  %v786_v16 = vsub.f32 %v2370_v37, %v319_v20  ;;  %v2375_v24 = vld [vmem:[#allocation26_spill] sm:$0xff] }
 0x1ae   : > { %v1400_v10 = vpop.eup %1399  ;;  %v811_v32 = vmul.f32 %v1398_v4, %v779_v0  ;;  %1419 = vrcp.f32 %v706_v42  ;;  %v783_v0 = vsub.f32 %v2368_v7, %v316_v14  ;;  %v799_v60 = vsub.f32 %v2369_v63, %v332_v55 }
 0x1af   : > { %v1402_v58 = vpop.eup %1401  ;;  %v860_v56 = vadd.f32 %v828_v59, %v329_v6  ;;  %v827_v26 = vmul.f32 %v1400_v10, %v795_v30  ;;  %1421 = vpow2.f32 %v1047_v2  ;;  %v335_v30 = vld [vmem:[%s1838_s14 + $0xe8] sm:$0xff] }
 0x1b0   : > { %v1404_v49 = vpop.eup %1403  ;;  %v843_v23 = vadd.f32 %v811_v32, %v2152_v50  ;;  %v814_v38 = vmul.f32 %v1402_v58, %v782_v48  ;;  %1423 = vpow2.f32 %v1063_v34  ;;  %v318_v32 = vld [vmem:[%s1838_s14 + $0x60] sm:$0xff]  ;;  %v321_v58 = vld [vmem:[%s1838_s14 + $0x78] sm:$0xff] }
 0x1b1   : > { %v1406_v9 = vpop.eup %1405  ;;  %892 = vst [vmem:[%s2097_s11 + $0xb8] sm:$0xff] %v860_v56  ;;  %v859_v6 = vadd.f32 %v827_v26, %v2155_v5  ;;  %v830_v44 = vmul.f32 %v1404_v49, %v798_v45  ;;  %1425 = vpow2.f32 %v1050_v35  ;;  %v337_v26 = vld [vmem:[%s1838_s14 + $0xf8] sm:$0xff] }
 0x1b2   : > { %v1408_v22 = vpop.eup %1407  ;;  %875 = vst [vmem:[%s2097_s11 + $0x30] sm:$0xff] %v843_v23  ;;  %v846_v50 = vadd.f32 %v814_v38, %v2171_v31  ;;  %v813_v3 = vmul.f32 %v1406_v9, %v781_v36  ;;  %1427 = vpow2.f32 %v1066_v27  ;;  %v2371_v36 = vld [vmem:[#allocation22_spill] sm:$0xff]  ;;  %v336_v23 = vld [vmem:[%s1838_s14 + $0xf0] sm:$0xff]  ;;  %v2374_v38 = vld [vmem:[#allocation25_spill] sm:$0xff] }
 0x1b3   : > { %v1410_v1 = vpop.eup %1409  ;;  %891 = vst [vmem:[%s2097_s11 + $0xb0] sm:$0xff] %v859_v6  ;;  %v862_v13 = vadd.f32 %v830_v44, %v331_v40  ;;  %v829_v5 = vmul.f32 %v1408_v22, %v797_v39  ;;  %1429 = vpow2.f32 %v1049_v33  ;;  %v802_v51 = vsub.f32 %v2371_v36, %v335_v30  ;;  %v334_v27 = vld [vmem:[%s1838_s14 + $0xe0] sm:$0xff]  ;;  %v2373_v33 = vld [vmem:[#allocation20_spill] sm:$0xff]  ;;  %v2376_v6 = vld [vmem:[#allocation23_spill] sm:$0xff] }
 0x1b4   : > { %v1412_v53 = vpop.eup %1411  ;;  %878 = vst [vmem:[%s2097_s11 + $0x48] sm:$0xff] %v846_v50  ;;  %v845_v28 = vadd.f32 %v813_v3, %v2160_v15  ;;  %v816_v46 = vmul.f32 %v1410_v1, %v784_v61  ;;  %1431 = vpow2.f32 %v1065_v11  ;;  %v801_v49 = vsub.f32 %v2373_v33, %v334_v27 }
 0x1b5   : > { %v1414_v31 = vpop.eup %1413  ;;  %894 = vst [vmem:[%s2097_s11 + $0xc8] sm:$0xff] %v862_v13  ;;  %v861_v52 = vadd.f32 %v829_v5, %v2167_v47  ;;  %v832_v48 = vmul.f32 %v1412_v53, %v800_v12  ;;  %v788_v11 = vsub.f32 %v2374_v38, %v321_v58  ;;  %v804_v12 = vsub.f32 %v2375_v24, %v337_v26 }
 0x1b6   : > { %v1416_v39 = vpop.eup %1415  ;;  %877 = vst [vmem:[%s2097_s11 + $0x40] sm:$0xff] %v845_v28  ;;  %v848_v40 = vadd.f32 %v816_v46, %v2189_v29  ;;  %v815_v21 = vmul.f32 %v1414_v31, %v783_v0  ;;  %v2377_v0 = vld [vmem:[#allocation24_spill] sm:$0xff] }
 0x1b7   : > { %v1418_v17 = vpop.eup %1417  ;;  %893 = vst [vmem:[%s2097_s11 + $0xc0] sm:$0xff] %v861_v52  ;;  %v864_v15 = vadd.f32 %v832_v48, %v333_v62  ;;  %v831_v18 = vmul.f32 %v1416_v39, %v799_v60 }
 0x1b8   : > { %v1420_v41 = vpop.eup %1419  ;;  %880 = vst [vmem:[%s2097_s11 + $0x58] sm:$0xff] %v848_v40  ;;  %v847_v2 = vadd.f32 %v815_v21, %v316_v14  ;;  %v818_v19 = vmul.f32 %v1418_v17, %v786_v16  ;;  %v2372_v14 = vld [vmem:[#allocation19_spill] sm:$0xff] }
 0x1b9   : > { %v1422_v43 = vpop.eup %1421  ;;  %896 = vst [vmem:[%s2097_s11 + $0xd8] sm:$0xff] %v864_v15  ;;  %v863_v47 = vadd.f32 %v831_v18, %v332_v55  ;;  %v834_v57 = vmul.f32 %v1420_v41, %v802_v51  ;;  %v785_v56 = vsub.f32 %v2372_v14, %v318_v32  ;;  %v320_v55 = vld [vmem:[%s1838_s14 + $0x70] sm:$0xff] }
 0x1ba   : > { %v1424_v42 = vpop.eup %1423  ;;  %879 = vst [vmem:[%s2097_s11 + $0x50] sm:$0xff] %v847_v2  ;;  %v850_v34 = vadd.f32 %v818_v19, %v319_v20  ;;  %v689_v29 = vadd.f32 1.0, %v1422_v43  ;;  %v787_v44 = vsub.f32 %v2376_v6, %v320_v55 }
 0x1bb   : > { %v1426_v8 = vpop.eup %1425  ;;  %895 = vst [vmem:[%s2097_s11 + $0xd0] sm:$0xff] %v863_v47  ;;  %v866_v4 = vadd.f32 %v834_v57, %v335_v30  ;;  %v705_v54 = vadd.f32 1.0, %v1424_v42  ;;  %v803_v30 = vsub.f32 %v2377_v0, %v336_v23 }
 0x1bc   : > { %v1428_v45 = vpop.eup %1427  ;;  %882 = vst [vmem:[%s2097_s11 + $0x68] sm:$0xff] %v850_v34  ;;  %1433 = vrcp.f32 %v689_v29  ;;  %v692_v59 = vadd.f32 1.0, %v1426_v8 }
 0x1bd   : > { %v1430_v35 = vpop.eup %1429  ;;  %898 = vst [vmem:[%s2097_s11 + $0xe8] sm:$0xff] %v866_v4  ;;  %1435 = vrcp.f32 %v705_v54  ;;  %v708_v10 = vadd.f32 1.0, %v1428_v45 }
 0x1be   : > { %v1432_v25 = vpop.eup %1431  ;;  %1437 = vrcp.f32 %v692_v59  ;;  %v691_v61 = vadd.f32 1.0, %v1430_v35 }
 0x1bf   : > { %1439 = vrcp.f32 %v708_v10  ;;  %v707_v62 = vadd.f32 1.0, %v1432_v25 }
 0x1c0   : > { %1441 = vrcp.f32 %v691_v61 }
 0x1c1   : > { %1443 = vrcp.f32 %v707_v62 }
 0x1c6   : > { %v1434_v9 = vpop.eup %1433 }
 0x1c7   : > { %v1436_v20 = vpop.eup %1435  ;;  %v817_v22 = vmul.f32 %v1434_v9, %v785_v56 }
 0x1c8   : > { %v1438_v7 = vpop.eup %1437  ;;  %v833_v50 = vmul.f32 %v1436_v20, %v801_v49 }
 0x1c9   : > { %v1440_v3 = vpop.eup %1439  ;;  %v849_v1 = vadd.f32 %v817_v22, %v318_v32  ;;  %v820_v63 = vmul.f32 %v1438_v7, %v788_v11 }
 0x1ca   : > { %v1442_v60 = vpop.eup %1441  ;;  %v865_v13 = vadd.f32 %v833_v50, %v334_v27  ;;  %v836_v5 = vmul.f32 %v1440_v3, %v804_v12 }
 0x1cb   : > { %v1444_v53 = vpop.eup %1443  ;;  %881 = vst [vmem:[%s2097_s11 + $0x60] sm:$0xff] %v849_v1  ;;  %v852_v37 = vadd.f32 %v820_v63, %v321_v58  ;;  %v819_v16 = vmul.f32 %v1442_v60, %v787_v44 }
 0x1cc   : > { %897 = vst [vmem:[%s2097_s11 + $0xe0] sm:$0xff] %v865_v13  ;;  %v868_v28 = vadd.f32 %v836_v5, %v337_v26  ;;  %v835_v46 = vmul.f32 %v1444_v53, %v803_v30 }
 0x1cd   : > { %884 = vst [vmem:[%s2097_s11 + $0x78] sm:$0xff] %v852_v37  ;;  %v851_v31 = vadd.f32 %v819_v16, %v320_v55 }
 0x1ce   : > { %900 = vst [vmem:[%s2097_s11 + $0xf8] sm:$0xff] %v868_v28  ;;  %v867_v36 = vadd.f32 %v835_v46, %v336_v23 }
 0x1cf   : > { %883 = vst [vmem:[%s2097_s11 + $0x70] sm:$0xff] %v851_v31 }
 0x1d0   : > { %899 = vst [vmem:[%s2097_s11 + $0xf0] sm:$0xff] %v867_v36 }
 0x1d1   : > { %1546 = shalt.err (!%p1543_p6)
}
 0x1d2   : > { %s1547_s30 = scalar_lea.hbm %s2247_s5, 4096  ;;  %s1551_s9 = scalar_lea.hbm %s2299_s4, 16384 }
 0x1d3   : > { %p1548_p8 = scmp.ne.s32.totalorder %s2247_s5, %s1547_s30  ;;  %p1552_p4 = scmp.lt.u32.totalorder %s2247_s5, %s2299_s4 }
 0x1d4   : > { %p1553_p10 = scmp.lt.u32.totalorder %s1551_s9, %s1547_s30  ;;  %p1555_p3 = scmp.lt.u32.totalorder %s1547_s30, %s2247_s5 }
 0x1d5   : > { %p1549_p11 = pnand %p1548_p8, %p1731_p12 }
 0x1d6   : > { %p1554_p13 = por %p1553_p10, %p1552_p4 }
 0x1d7   : > { %p1550_p0 = pneg %p1549_p11 }
 0x1d8   : > { %p1556_p7 = por %p1555_p3, %p1554_p13 }
 0x1da   : > { %p1557_p9 = pnand %p1556_p7, %p1550_p0 }
 0x1dc   : > { %1560 = shalt.err (!%p1557_p9)
}
 0x1dd   : > { %s1615_s12 = smov 128   ;;  %s1616_s14 = smov 8  }
 0x1de   : > { %1259 = dma.vmem_to_hbm [thread:$0]  (%p1731_p12), %s2249_s8, 4096, %s2247_s5, %s902_s3, %s1615_s12, %s1615_s12, %s1616_s14  }
 0x1df PF: > { %p1279_p1 = scmp.ge.s32.totalorder %s1607_s20, 2  ;;  %s930_s22 = sand.u32 1, %s1595_s17  }
 0x1e0   : > { %p2378_p5 = scmp.ne.s32.totalorder %s2323_s23, 0  ;;  %s931_s11 = scalar_lea.sflag [#allocation5], %s930_s22 }
 0x1e2   : > { %p1273_p2 = pnand %p1279_p1, %p2378_p5 }
 0x1e4   : > { %1590 = dma.done.wait (!%p1273_p2), %s931_s11, 4096  }
 0x1e5   : > { %1592 = vsyncadd (!%p1273_p2), %s931_s11, 4294963200  ;;  %p21_p6 = scmp.ge.s32.totalorder %s1698_s28, 6   ;;  %s2379_s17 = smov %s1599_s18 }
 0x1e6   : > { %s2380_s18 = smov %s1603_s19  ;;  %s2381_s19 = smov %s1727_s21 }
 0x1e7   : > { %s2382_s20 = smov %s1698_s28  ;;  %23 = sbr.rel (!%p21_p6) target bundleno = 11 (0xb), region = 98 }
 0x1ee   :  { %936 = vsyncpa [#allocation4], 1 }
 0x1ef   :  { %938 = vsyncpa [#allocation4 + $0x1], 1 }
 0x1f0   :  { %939 = vsyncpa [#allocation7], 1 }
 0x1f1   :  { %941 = vsyncpa [#allocation7 + $0x1], 1 }
 0x1f2   :  { %942 = vsyncpa [#allocation5], 1 }
 0x1f3   :  { %944 = vsyncpa [#allocation5 + $0x1], 1 }

</bundles_post_ra>
